<compile_context>
chip_gen: v5e
topology: v5e:2x2
jax: 0.10.0
libtpu: 0.0.40
codegen_flags: <defaults>
</compile_context>

<pallas_src>
import functools

import jax
import jax.numpy as jnp
from jax.experimental import pallas as pl
from jax.experimental.pallas import tpu as pltpu


def _pick_row_block(rows, cap=32):
    """Largest row block <= cap that divides `rows` and is sublane-aligned."""
    if rows <= cap:
        return rows
    for rb in range(cap, 7, -1):
        if rows % rb == 0 and rb % 8 == 0:
            return rb
    return rows  # fallback: no clean split (rare); keep the full row dim


def _soft_dice_partial_kernel(p_ref, t_ref, out_ref, *, inner, n_chunks,
                              unroll):
    """Partial sums over one (row_block, tile_d) block.

    Writes, per sub-row:  [sum(sigmoid(p) * t), sum(sigmoid(p) + t)].
    Lane (XLU) reductions happen once per block, not per chunk.
    """
    row_block = p_ref.shape[0]

    def chunk(off, carry):
        inter_acc, denom_acc = carry
        p = jax.nn.sigmoid(p_ref[:, pl.ds(off, inner)].astype(jnp.float32))
        t = t_ref[:, pl.ds(off, inner)].astype(jnp.float32)
        return inter_acc + p * t, denom_acc + (p + t)

    zero = jnp.zeros((row_block, inner), jnp.float32)
    carry = (zero, zero)
    if n_chunks <= 8:
        # Tiny trip count: fully unroll statically (no loop at all).
        for i in range(n_chunks):
            carry = chunk(i * inner, carry)
    else:
        def body(i, c):
            return chunk(pl.multiple_of(i * inner, inner), c)
        carry = jax.lax.fori_loop(0, n_chunks, body, carry, unroll=unroll)
    inter_acc, denom_acc = carry

    inter = jnp.sum(inter_acc, axis=1, keepdims=True)   # (row_block, 1)
    denom = jnp.sum(denom_acc, axis=1, keepdims=True)   # (row_block, 1)
    out_ref[...] = jnp.concatenate([inter, denom], axis=1).reshape(
        1, 1, row_block, 2)


def soft_dice_loss(probs, targets):
    """Pallas implementation of SoftDiceLoss.forward(probs, targets)."""
    n = probs.shape[0]
    d = 1
    for x in probs.shape[1:]:
        d *= x

    bp = jnp.dtype(probs.dtype).itemsize
    bt = jnp.dtype(targets.dtype).itemsize

    # --- sub-row split: a free (contiguous) reshape so the block's sublane
    # dim reaches full vreg occupancy for the dtype (8 f32 / 16 bf16 / 32 i8).
    target_rows = max(8, 32 // max(1, min(bp, bt)))
    s = 1
    while n * s < target_rows and d % (2 * s) == 0 and d // (2 * s) >= 128:
        s *= 2
    rows, row_len = n * s, d // s
    p3 = probs.reshape(rows, row_len)
    t3 = targets.reshape(rows, row_len)

    # --- row blocking (second "parallel" grid axis) for large batches,
    # instead of shrinking the chunk width.
    row_block = _pick_row_block(rows, cap=32)
    nr = rows // row_block

    # --- inner chunk width (lanes per loop step): keep the two full-width f32
    # accumulators + chunk temporaries within a handful of vregs.
    inner = 512 if row_len >= 512 else (256 if row_len >= 256 else
                                        (128 if row_len >= 128 else 0))
    while inner > 128 and row_block * inner > 4096:
        inner //= 2

    if inner == 0 or row_len // inner == 0:
        # Degenerate tiny feature dim: plain JAX (nothing useful to tile).
        m1 = jax.nn.sigmoid(p3.astype(jnp.float32))
        m2 = t3.astype(jnp.float32)
        inter_rows = jnp.sum(m1 * m2, axis=1)
        denom_rows = jnp.sum(m1 + m2, axis=1)
    else:
        chunks_total = row_len // inner
        # ~4 MiB of combined (p + t) input per grid step (~8 MiB when
        # double-buffered): already at the HBM roofline on v5e/v6e/v7x.
        cpb = max(1, min(chunks_total,
                         (4 << 20) // (row_block * inner * (bp + bt))))
        nk = chunks_total // cpb
        nk = max(nk, min(8, chunks_total))     # enough steps to pipeline
        if nk >= 2 and nk % 2 == 1:            # balance v7x's two TensorCores
            nk = nk + 1 if nk + 1 <= chunks_total else nk - 1
        nk = max(1, min(nk, chunks_total))
        cpb = chunks_total // nk
        tile_d = cpb * inner
        main_len = nk * tile_d                 # always <= row_len (no padding)

        vmem_limit = int(max(8 << 20,
                             2 * row_block * tile_d * (bp + bt) + (4 << 20)))

        kernel = functools.partial(
            _soft_dice_partial_kernel, inner=inner, n_chunks=cpb,
            unroll=min(4, cpb))

        out_b = pl.pallas_call(
            kernel,
            out_shape=jax.ShapeDtypeStruct((nr, nk, row_block, 2),
                                           jnp.float32),
            grid=(nr, nk),
            in_specs=[
                pl.BlockSpec((row_block, tile_d), lambda r, k: (r, k)),
                pl.BlockSpec((row_block, tile_d), lambda r, k: (r, k)),
            ],
            out_specs=pl.BlockSpec((1, 1, row_block, 2),
                                   lambda r, k: (r, k, 0, 0)),
            compiler_params=pltpu.CompilerParams(
                dimension_semantics=("parallel", "parallel"),
                vmem_limit_bytes=vmem_limit),
        )(p3, t3)

        part = jnp.sum(out_b, axis=1).reshape(rows, 2)     # (rows, 2)
        inter_rows = part[:, 0]
        denom_rows = part[:, 1]

        if main_len < row_len:
            # Ragged tail (< one chunk per sub-row beyond the tiled prefix):
            # tiny JAX-side reduction instead of padding or in-kernel masking.
            tp = jax.nn.sigmoid(p3[:, main_len:].astype(jnp.float32))
            tt = t3[:, main_len:].astype(jnp.float32)
            inter_rows = inter_rows + jnp.sum(tp * tt, axis=1)
            denom_rows = denom_rows + jnp.sum(tp + tt, axis=1)

    # Tiny final combine: sub-rows -> batch rows -> scalar loss.
    smooth = jnp.float32(1.0)
    inter = inter_rows.reshape(n, s).sum(axis=1)
    denom = denom_rows.reshape(n, s).sum(axis=1)
    score = 2.0 * (inter + smooth) / (denom + smooth)
    return jnp.float32(1.0) - jnp.sum(score) / jnp.float32(n)


def soft_dice_loss_ref(probs, targets):
    """Pure-JAX reference mirroring the PyTorch forward."""
    smooth = 1.0
    num = probs.shape[0]
    m1 = jax.nn.sigmoid(probs.astype(jnp.float32)).reshape(num, -1)
    m2 = targets.astype(jnp.float32).reshape(num, -1)
    inter = (m1 * m2).sum(axis=1)
    score = 2.0 * (inter + smooth) / (m1.sum(axis=1) + m2.sum(axis=1) + smooth)
    return 1.0 - score.sum() / num


if __name__ == "__main__":
    key = jax.random.PRNGKey(0)
    k1, k2 = jax.random.split(key)
    # batch=2, channels=4, spatial=16x16  ->  D = 4*16*16 = 1024 per row
    probs = jax.random.normal(k1, (2, 4, 16, 16), dtype=jnp.float32)
    targets = (jax.random.uniform(k2, (2, 4, 16, 16)) > 0.5).astype(jnp.float32)

    loss = soft_dice_loss(probs, targets)
    jax.block_until_ready(loss)
    ref = soft_dice_loss_ref(probs, targets)
    assert jnp.allclose(loss, ref, atol=1e-5, rtol=1e-5), (loss, ref)

    # Reduced-HBM-traffic path: bf16 logits + bf16 binary targets (the kernel
    # upcasts to f32 in-body; sublane split adapts to the 2-byte dtype).
    loss_lp = soft_dice_loss(probs.astype(jnp.bfloat16),
                             targets.astype(jnp.bfloat16))
    jax.block_until_ready(loss_lp)
    ref_lp = soft_dice_loss_ref(probs.astype(jnp.bfloat16), targets)
    assert jnp.allclose(loss_lp, ref_lp, atol=1e-4, rtol=1e-4), (loss_lp, ref_lp)

    print("KERNEL_OK")
</pallas_src>

<mosaic_0001>
module attributes {stable_mosaic.version = 11 : i64} {
  func.func @_soft_dice_partial_kernel(%arg0: i32, %arg1: i32, %arg2: memref<8x256xf32, #tpu.memory_space<vmem>>, %arg3: memref<8x256xf32, #tpu.memory_space<vmem>>, %arg4: memref<1x1x8x2xf32, #tpu.memory_space<vmem>>) attributes {dimension_semantics = [#tpu.dimension_semantics<parallel>, #tpu.dimension_semantics<parallel>], iteration_bounds = array<i64: 1, 1>, scalar_prefetch = 0 : i64, scratch_operands = 0 : i64, tpu.core_type = #tpu.core_type<tc>, window_params = [{transform_indices = @transform_0, window_bounds = array<i64: 8, 256>}, {transform_indices = @transform_1, window_bounds = array<i64: 8, 256>}, {transform_indices = @transform_2, window_bounds = array<i64: 1, 1, 8, 2>}]} {
    %cst = arith.constant 0.000000e+00 : f32
    %0 = vector.broadcast %cst : f32 to vector<8x256xf32>
    %c0 = arith.constant 0 : index
    %c0_0 = arith.constant 0 : index
    %1 = vector.load %arg2[%c0, %c0_0] : memref<8x256xf32, #tpu.memory_space<vmem>>, vector<8x256xf32>
    %2 = arith.negf %1 : vector<8x256xf32>
    %3 = math.exp %2 : vector<8x256xf32>
    %cst_1 = arith.constant 1.000000e+00 : f32
    %4 = vector.broadcast %cst_1 : f32 to vector<8x256xf32>
    %5 = arith.addf %4, %3 : vector<8x256xf32>
    %6 = arith.divf %4, %5 : vector<8x256xf32>
    %c0_2 = arith.constant 0 : index
    %c0_3 = arith.constant 0 : index
    %7 = vector.load %arg3[%c0_2, %c0_3] : memref<8x256xf32, #tpu.memory_space<vmem>>, vector<8x256xf32>
    %8 = arith.mulf %6, %7 : vector<8x256xf32>
    %9 = arith.addf %0, %8 : vector<8x256xf32>
    %10 = arith.addf %6, %7 : vector<8x256xf32>
    %11 = arith.addf %0, %10 : vector<8x256xf32>
    %cst_4 = arith.constant dense<0.000000e+00> : vector<8xf32>
    %12 = vector.multi_reduction <add>, %9, %cst_4 [1] : vector<8x256xf32> to vector<8xf32>
    %13 = vector.shape_cast %12 : vector<8xf32> to vector<8x1xf32>
    %cst_5 = arith.constant dense<0.000000e+00> : vector<8xf32>
    %14 = vector.multi_reduction <add>, %11, %cst_5 [1] : vector<8x256xf32> to vector<8xf32>
    %15 = vector.shape_cast %14 : vector<8xf32> to vector<8x1xf32>
    %16 = tpu.concatenate %13, %15 in 1 : vector<8x1xf32>, vector<8x1xf32> -> vector<8x2xf32>
    %17 = vector.shape_cast %16 : vector<8x2xf32> to vector<1x1x8x2xf32>
    %c0_6 = arith.constant 0 : index
    %c0_7 = arith.constant 0 : index
    %c0_8 = arith.constant 0 : index
    %c0_9 = arith.constant 0 : index
    %18 = vector.load %arg4[%c0_6, %c0_7, %c0_8, %c0_9] : memref<1x1x8x2xf32, #tpu.memory_space<vmem>>, vector<1x1x8x2xf32>
    tpu.vector_store %arg4[%c0_6, %c0_7, %c0_8, %c0_9], %17 {strides = array<i32>} : memref<1x1x8x2xf32, #tpu.memory_space<vmem>>, vector<1x1x8x2xf32>,
    return
  }
  func.func @transform_0(%arg0: i32, %arg1: i32) -> (i32, i32) {
    %c0_i32 = arith.constant 0 : i32
    return %arg0, %arg1 : i32, i32
  }
  func.func @transform_1(%arg0: i32, %arg1: i32) -> (i32, i32) {
    %c0_i32 = arith.constant 0 : i32
    return %arg0, %arg1 : i32, i32
  }
  func.func @transform_2(%arg0: i32, %arg1: i32) -> (i32, i32, i32, i32) {
    %c0_i32 = arith.constant 0 : i32
    %c0_i32_0 = arith.constant 0 : i32
    %c0_i32_1 = arith.constant 0 : i32
    return %arg0, %arg1, %c0_i32, %c0_i32_0 : i32, i32, i32, i32
  }
}

</mosaic_0001>

<bundles_post_ra>
// kernel: tpu_custom_call.1
= control target key start
LH: loop header
LB: loop body
LE: loop exit
PB: predicated region body
PF: predicated region fallthrough
CT: control target
= control target key end

     0   :  { %7 = vsyncpa [#allocation3], 0  ;;  %s195_s0 = inlined_call_operand.hbm [shape: f32[8,256], index: 0, kind: input, shape index: {}]   ;;  %s196_s1 = inlined_call_operand.hbm [shape: f32[8,256], index: 1, kind: input, shape index: {}]   ;;  %s197_s2 = inlined_call_operand.vmem [shape: f32[1,1,8,2], index: 2, kind: output, shape index: {}]  }
   0x1   :  { %s14_s11 = sshll.u32 %s195_s0, 4  ;;  %s15_s11 = int_to_ptr.hbm [resolvable:$true] %s14_s11 }
   0x2   :  { %8 = vsyncpa [#allocation5], 0  ;;  %s169_s12 = smov [#allocation2]   ;;  %s25_s16 = sshll.u32 %s196_s1, 4  ;;  %s26_s16 = int_to_ptr.hbm [resolvable:$true] %s25_s16 }
   0x3   :  { %s16_s13 = sshll.u32 %s169_s12, 4  ;;  %s170_s17 = smov [#allocation4]   ;;  %s17_s13 = int_to_ptr.vmem [resolvable:$true] %s16_s13 }
   0x4   :  { %19 = dma.hbm_to_vmem [thread:$0]  %s15_s11, 256, %s17_s13, [#allocation3]  }
   0x5   :  { %s27_s18 = sshll.u32 %s170_s17, 4  ;;  %s28_s18 = int_to_ptr.vmem [resolvable:$true] %s27_s18 }
   0x6   :  { %30 = dma.hbm_to_vmem [thread:$0]  %s26_s16, 256, %s28_s18, [#allocation5]  }
   0x7   :  { %165 = dma.done.wait [#allocation3], 256  }
   0x8   :  { %166 = vsyncadd [#allocation3], 4294967040 }
   0x9   :  { %167 = dma.done.wait [#allocation5], 256  }
   0xa   :  { %168 = vsyncadd [#allocation5], 4294967040  ;;  %v39_v0 = vld [vmem:[#allocation2] sm:$0xff]  ;;  %v40_v1 = vld [vmem:[#allocation2 + $0x8] sm:$0xff]  ;;  %vm95_vm8 = vcmask 7168   ;;  %vm97_vm9 = vcmask 15360  }
   0xb   :  { %v105_v2 = vmul.f32 -1.442695, %v39_v0  ;;  %v106_v3 = vmul.f32 -1.442695, %v40_v1  ;;  %v79_v24 = vld [vmem:[#allocation4] sm:$0xff]  ;;  %v80_v26 = vld [vmem:[#allocation4 + $0x8] sm:$0xff] }
   0xd   :  { %109 = vpow2.f32 %v105_v2 }
   0xe   :  { %111 = vpow2.f32 %v106_v3 }
  0x13   :  { %v110_v4 = vpop.eup %109 }
  0x14   :  { %v112_v5 = vpop.eup %111  ;;  %v47_v6 = vadd.f32 1.0, %v110_v4 }
  0x15   :  { %v48_v7 = vadd.f32 1.0, %v112_v5 }
  0x16   :  { %113 = vrcp.f32 %v47_v6  ;;  %vm54_vm0 = vweird.f32 %v47_v6  ;;  %v60_v11 = vand.u32 2147483648, %v47_v6  ;;  %v58_v14 = vand.u32 2147483647, %v47_v6 }
  0x17   :  { %115 = vrcp.f32 %v48_v7  ;;  %v75_v15 = vand.u32 2147483648, %v48_v7  ;;  %vm69_vm2 = vweird.f32 %v48_v7  ;;  %v73_v17 = vand.u32 2147483647, %v48_v7 }
  0x18   :  { %v61_v19 = vor.u32 1.1754944e-38, %v60_v11  ;;  %vm59_vm5 = vcmp.eq.f32.partialorder %v58_v14, 8.507059e+37 }
  0x19   :  { %v76_v22 = vor.u32 1.1754944e-38, %v75_v15  ;;  %vm74_vm7 = vcmp.eq.f32.partialorder %v73_v17, 8.507059e+37 }
  0x1c   :  { %v114_v8 = vpop.eup %113 }
  0x1d   :  { %v116_v9 = vpop.eup %115  ;;  %v50_v10 = vmul.f32 %v114_v8, %v47_v6  ;;  %vm55_vm1 = vweird.f32 %v114_v8 }
  0x1e   :  { %v65_v12 = vmul.f32 %v116_v9, %v48_v7  ;;  %vm70_vm3 = vweird.f32 %v116_v9  ;;  %vm56_vm4 = vmor %vm54_vm0, %vm55_vm1 }
  0x1f   :  { %v51_v13 = vsub.f32 1.0, %v50_v10  ;;  %vm71_vm6 = vmor %vm69_vm2, %vm70_vm3 }
  0x20   :  { %v66_v16 = vsub.f32 1.0, %v65_v12 }
  0x21   :  { %v52_v18 = vmul.f32 %v114_v8, %v51_v13 }
  0x22   :  { %v67_v20 = vmul.f32 %v116_v9, %v66_v16 }
  0x23   :  { %v53_v21 = vadd.f32 %v114_v8, %v52_v18 }
  0x24   :  { %v68_v23 = vadd.f32 %v116_v9, %v67_v20 }
  0x25   :  { %v57_v25 = vsel %vm56_vm4, %v114_v8, %v53_v21 }
  0x26   :  { %v62_v27 = vsel %vm59_vm5, %v61_v19, %v57_v25  ;;  %v72_v28 = vsel %vm71_vm6, %v116_v9, %v68_v23 }
  0x27   :  { %v77_v29 = vsel %vm74_vm7, %v76_v22, %v72_v28  ;;  %v81_v30 = vmul.f32 %v79_v24, %v62_v27  ;;  %v85_v33 = vadd.f32 %v79_v24, %v62_v27 }
  0x28   :  { %v82_v31 = vmul.f32 %v80_v26, %v77_v29  ;;  %v86_v34 = vadd.f32 %v80_v26, %v77_v29 }
  0x2a   :  { %v89_v32 = vadd.f32 %v82_v31, %v81_v30  ;;  %v92_v35 = vadd.f32 %v86_v34, %v85_v33 }
  0x2c   :  { %90 = vadd.xlane.f32.xlu0 %v89_v32 }
  0x34   :  { %93 = vadd.xlane.f32.xlu0 %v92_v35 }
  0x9f   :  { %v91_v36 = vpop.xlane.xlu0 %90 }
  0xa7   :  { %v94_v37 = vpop.xlane.xlu0 %93 }
  0xa8   :  { %v96_v38 = vsel %vm95_vm8, %v91_v36, %v94_v37 }
  0xa9   :  { %98 = vst.msk [vmem:[%s197_s2] sm:$0xff] %vm97_vm9, %v96_v38 }
  0xaa   :  { %103 = vsyncpa [#allocation3], 1 }
  0xab   :  { %104 = vsyncpa [#allocation5], 1 }

</bundles_post_ra>
